<compile_context>
chip_gen: v6e
topology: v6e:2x2x1
jax: 0.10.0
libtpu: 0.0.40
codegen_flags: <defaults>
</compile_context>

<pallas_src>
import functools
import math

import jax
import jax.numpy as jnp
from jax.experimental import pallas as pl
from jax.experimental.pallas import tpu as pltpu

EPS = 1e-5  # nn.LayerNorm default


def _round_up(n, m):
    return ((n + m - 1) // m) * m


def _layernorm(x, gamma, beta, n, n_pad):
    """Two-pass LayerNorm over the last axis.

    `n` is the TRUE feature count, `n_pad` the (lane-aligned) padded width. Padded
    lanes of `x` are guaranteed zero, so each contributes mu^2 to sum((x-mu)^2);
    subtracting (n_pad - n)*mu^2 makes the statistics exact without a mask.
    """
    inv_n = 1.0 / float(n)
    mu = jnp.sum(x, axis=-1, keepdims=True) * inv_n
    xc = x - mu
    ss = jnp.sum(xc * xc, axis=-1, keepdims=True)
    if n_pad != n:
        ss = ss - float(n_pad - n) * (mu * mu)
    var = jnp.maximum(ss * inv_n, 0.0)
    return xc * jax.lax.rsqrt(var + EPS) * gamma + beta


def mlp_base_kernel(x_ref, pp_ref, w1_ref, w2_ref, o_ref,
                    *, d, h1, h2, dp, h1p, h2p):
    x = x_ref[...].astype(jnp.float32)

    # Packed parameter rows (static, lane-aligned slices):
    fn_g = pp_ref[0:1, :dp]
    fn_b = pp_ref[1:2, :dp]
    b1 = pp_ref[2:3, :h1p]
    ln1_g = pp_ref[3:4, :h1p]
    ln1_b = pp_ref[4:5, :h1p]
    b2 = pp_ref[5:6, :h2p]
    ln2_g = pp_ref[6:7, :h2p]
    ln2_b = pp_ref[7:8, :h2p]

    mxu_dtype = w1_ref.dtype  # bf16 (default) or f32; cast only at the dot.

    # feature_norm (use_feature_normalization=True)
    x = _layernorm(x, fn_g, fn_b, d, dp)

    # layer 1: Linear -> ReLU -> LayerNorm
    h = jnp.dot(x.astype(mxu_dtype), w1_ref[...],
                preferred_element_type=jnp.float32) + b1
    h = jnp.maximum(h, 0.0)
    h = _layernorm(h, ln1_g, ln1_b, h1, h1p)

    # layer 2: Linear -> ReLU -> LayerNorm
    h = jnp.dot(h.astype(mxu_dtype), w2_ref[...],
                preferred_element_type=jnp.float32) + b2
    h = jnp.maximum(h, 0.0)
    h = _layernorm(h, ln2_g, ln2_b, h2, h2p)

    o_ref[...] = h.astype(o_ref.dtype)


def prepare_params(params, *, mxu_dtype=jnp.bfloat16):
    """One-time packing/padding of parameters (do NOT redo this every forward call)."""
    D, H1 = params["w1"].shape
    H2 = params["w2"].shape[1]
    Dp, H1p, H2p = (_round_up(n, 128) for n in (D, H1, H2))
    Pmax = max(Dp, H1p, H2p)
    f32 = jnp.float32

    w1p = jnp.zeros((Dp, H1p), mxu_dtype).at[:D, :H1].set(params["w1"].astype(mxu_dtype))
    w2p = jnp.zeros((H1p, H2p), mxu_dtype).at[:H1, :H2].set(params["w2"].astype(mxu_dtype))

    def row(v, n):
        return jnp.zeros((Pmax,), f32).at[:n].set(v.reshape(-1).astype(f32))

    # Pack the 8 small parameter vectors into one array -> single DMA.
    pp = jnp.stack([
        row(params["fn_g"], D), row(params["fn_b"], D),
        row(params["b1"], H1), row(params["ln1_g"], H1), row(params["ln1_b"], H1),
        row(params["b2"], H2), row(params["ln2_g"], H2), row(params["ln2_b"], H2),
    ], axis=0)

    return {"dims": (D, H1, H2, Dp, H1p, H2p, Pmax), "w1p": w1p, "w2p": w2p, "pp": pp}


def mlp_base_forward(x, prep, *, batch_tile=512, out_dtype=jnp.float32):
    """x: [B, obs_dim]. prep: output of prepare_params."""
    B, D = x.shape
    D0, H1, H2, Dp, H1p, H2p, Pmax = prep["dims"]
    assert D == D0, "input feature dim does not match prepared params"
    w1p, w2p, pp = prep["w1p"], prep["w2p"], prep["pp"]
    wbytes = w1p.dtype.itemsize

    # Batch tile: sublane-aligned, aim for >=2 grid steps (v7x megacore + DMA overlap).
    if B < 8:
        TB = B                      # block equals full batch dim
    else:
        TB = min(batch_tile, _round_up(pl.cdiv(B, 2), 8))   # always <= B when B >= 8
    grid_b = pl.cdiv(B, TB)         # partial last tile handled by Pallas

    # Only pad the feature dim when LayerNorm needs it (lane alignment + zero pads).
    x = x.astype(jnp.float32)
    xp = x if D == Dp else jnp.zeros((B, Dp), jnp.float32).at[:, :D].set(x)

    # Generation-aware VMEM budget (v7x: 64 MiB/TC; v5e/v6e: 128 MiB).
    vmem_bytes = (
        2 * TB * Dp * 4                          # x tile, double-buffered
        + 2 * TB * H2p * 4                       # out tile, double-buffered
        + (Dp * H1p + H1p * H2p) * wbytes        # weights, single-buffered
        + 8 * Pmax * 4                           # packed params, single-buffered
        + TB * (Dp + 2 * H1p + H2p) * 4          # f32 LN/ReLU intermediates
        + TB * (Dp + H1p) * wbytes               # bf16 casts fed to the MXU
        + (2 << 20)                              # compiler internal scratch headroom
    )
    try:
        vmem_cap = int(pltpu.get_tpu_info().vmem_capacity_bytes)
    except Exception:
        vmem_cap = 64 * 2**20
    vmem_limit = int(min(max(vmem_bytes, 32 * 2**20), int(vmem_cap * 0.85)))

    flops = 2 * B * (Dp * H1p + H1p * H2p)
    bytes_accessed = int(B * Dp * 4 + B * H2p * 4
                         + (Dp * H1p + H1p * H2p) * wbytes + 8 * Pmax * 4)

    kernel = functools.partial(mlp_base_kernel,
                               d=D, h1=H1, h2=H2, dp=Dp, h1p=H1p, h2p=H2p)

    out = pl.pallas_call(
        kernel,
        out_shape=jax.ShapeDtypeStruct((B, H2p), out_dtype),
        grid_spec=pltpu.PrefetchScalarGridSpec(
            num_scalar_prefetch=0,
            grid=(grid_b,),
            in_specs=[
                pl.BlockSpec((TB, Dp), lambda i: (i, 0)),        # x: tiled over batch
                pl.BlockSpec((8, Pmax), lambda i: (0, 0),        # packed params: resident,
                             pipeline_mode=pl.Buffered(1)),      #   single-buffered
                pl.BlockSpec((Dp, H1p), lambda i: (0, 0),        # W1^T: resident,
                             pipeline_mode=pl.Buffered(1)),      #   single-buffered
                pl.BlockSpec((H1p, H2p), lambda i: (0, 0),       # W2^T: resident,
                             pipeline_mode=pl.Buffered(1)),      #   single-buffered
            ],
            out_specs=pl.BlockSpec((TB, H2p), lambda i: (i, 0)),
        ),
        compiler_params=pltpu.CompilerParams(
            dimension_semantics=("parallel",),   # megacore-shard batch tiles on v7x
            vmem_limit_bytes=vmem_limit,
        ),
        cost_estimate=pl.CostEstimate(
            flops=flops, transcendentals=3 * B, bytes_accessed=bytes_accessed),
    )(xp, pp, w1p, w2p)

    return out if H2 == H2p else out[:, :H2]
    # TODO(synk): for non-toy hidden widths that exceed v7x's 64 MiB VMEM even with bf16
    # single-buffered weights, add a K/N weight-tiling grid axis ("arbitrary") with an
    # f32 VMEM accumulator and pl.when init/finalize instead of fully-resident weights.


def _orthogonal(key, out_dim, in_dim, gain):
    # Deterministic stand-in for nn.init.orthogonal_ (gain = calculate_gain('relu') = sqrt(2)).
    a = jax.random.normal(key, (max(out_dim, in_dim), min(out_dim, in_dim)), jnp.float32)
    q, r = jnp.linalg.qr(a)
    s = jnp.sign(jnp.diag(r))
    s = jnp.where(s == 0, 1.0, s)
    q = q * s
    if out_dim < in_dim:
        q = q.T
    return gain * q[:out_dim, :in_dim]


def init_params(key, obs_dim, hidden_sizes):
    assert len(hidden_sizes) == 2, "kernel is written for two hidden layers"
    gain = math.sqrt(2.0)  # nn.init.calculate_gain('relu')
    k1, k2 = jax.random.split(key)
    h1, h2 = hidden_sizes
    w1 = _orthogonal(k1, h1, obs_dim, gain).T  # pre-transposed -> [in, out]
    w2 = _orthogonal(k2, h2, h1, gain).T
    return {
        "fn_g": jnp.ones((1, obs_dim), jnp.float32), "fn_b": jnp.zeros((1, obs_dim), jnp.float32),
        "w1": w1, "b1": jnp.zeros((1, h1), jnp.float32),
        "ln1_g": jnp.ones((1, h1), jnp.float32), "ln1_b": jnp.zeros((1, h1), jnp.float32),
        "w2": w2, "b2": jnp.zeros((1, h2), jnp.float32),
        "ln2_g": jnp.ones((1, h2), jnp.float32), "ln2_b": jnp.zeros((1, h2), jnp.float32),
    }


def reference_forward(x, params, matmul_dtype=None):
    # Pure-JAX reference mirroring the PyTorch forward. matmul_dtype=jnp.bfloat16
    # reproduces the kernel's bf16-at-the-MXU numerics (f32 accumulation).
    def ln(v, g, b):
        mu = jnp.mean(v, -1, keepdims=True)
        var = jnp.mean((v - mu) ** 2, -1, keepdims=True)
        return (v - mu) / jnp.sqrt(var + EPS) * g + b

    def mm(a, w):
        if matmul_dtype is None:
            return a @ w
        return jnp.dot(a.astype(matmul_dtype), w.astype(matmul_dtype),
                       preferred_element_type=jnp.float32)

    x = ln(x, params["fn_g"], params["fn_b"])
    h = jnp.maximum(mm(x, params["w1"]) + params["b1"], 0.0)
    h = ln(h, params["ln1_g"], params["ln1_b"])
    h = jnp.maximum(mm(h, params["w2"]) + params["b2"], 0.0)
    return ln(h, params["ln2_g"], params["ln2_b"])


if __name__ == "__main__":
    key = jax.random.PRNGKey(0)
    kx, kp, kx2, kp2 = jax.random.split(key, 4)

    # Case 1: small, square shapes (exercise feature padding + LN pad-correction).
    B, obs_dim = 8, 32
    hidden_sizes = [32, 32]
    x = jax.random.normal(kx, (B, obs_dim), jnp.float32)
    params = init_params(kp, obs_dim, hidden_sizes)

    # bf16 MXU path (default) vs. bf16-matmul reference.
    prep_bf16 = prepare_params(params, mxu_dtype=jnp.bfloat16)
    out = mlp_base_forward(x, prep_bf16)
    jax.block_until_ready(out)
    ref_bf16 = reference_forward(x, params, matmul_dtype=jnp.bfloat16)
    assert out.shape == (B, hidden_sizes[-1])
    assert jnp.allclose(out, ref_bf16, atol=5e-3, rtol=5e-3), "mismatch vs bf16 reference (case 1)"

    # f32 MXU path vs. exact f32 reference (tight tolerance).
    prep_f32 = prepare_params(params, mxu_dtype=jnp.float32)
    out_f32 = mlp_base_forward(x, prep_f32)
    jax.block_until_ready(out_f32)
    ref = reference_forward(x, params)
    assert jnp.allclose(out_f32, ref, atol=1e-4, rtol=1e-4), "mismatch vs f32 reference (case 1)"

    # Case 2: ragged batch / mixed hidden sizes -> partial last batch tile, >=2 grid steps.
    B2, obs_dim2 = 13, 24
    hidden_sizes2 = [48, 40]
    x2 = jax.random.normal(kx2, (B2, obs_dim2), jnp.float32)
    params2 = init_params(kp2, obs_dim2, hidden_sizes2)

    prep2 = prepare_params(params2, mxu_dtype=jnp.bfloat16)
    out2 = mlp_base_forward(x2, prep2)
    jax.block_until_ready(out2)
    ref2 = reference_forward(x2, params2, matmul_dtype=jnp.bfloat16)
    assert out2.shape == (B2, hidden_sizes2[-1])
    assert jnp.allclose(out2, ref2, atol=5e-3, rtol=5e-3), "mismatch vs bf16 reference (case 2)"

    prep2_f32 = prepare_params(params2, mxu_dtype=jnp.float32)
    out2_f32 = mlp_base_forward(x2, prep2_f32)
    jax.block_until_ready(out2_f32)
    ref2_f32 = reference_forward(x2, params2)
    assert jnp.allclose(out2_f32, ref2_f32, atol=1e-4, rtol=1e-4), "mismatch vs f32 reference (case 2)"

    print("KERNEL_OK")
</pallas_src>

<mosaic_0001>
module attributes {stable_mosaic.version = 11 : i64} {
  func.func @mlp_base_kernel(%arg0: i32, %arg1: memref<8x128xf32, #tpu.memory_space<vmem>>, %arg2: memref<8x128xf32, #tpu.memory_space<vmem>>, %arg3: memref<128x128xbf16, #tpu.memory_space<vmem>>, %arg4: memref<128x128xbf16, #tpu.memory_space<vmem>>, %arg5: memref<8x128xf32, #tpu.memory_space<vmem>>) attributes {dimension_semantics = [#tpu.dimension_semantics<parallel>], iteration_bounds = array<i64: 1>, scalar_prefetch = 0 : i64, scratch_operands = 0 : i64, tpu.core_type = #tpu.core_type<tc>, window_params = [{transform_indices = @transform_0, window_bounds = array<i64: 8, 128>}, {pipeline_mode = #tpu.pipeline_mode<synchronous>, transform_indices = @transform_1, window_bounds = array<i64: 8, 128>}, {pipeline_mode = #tpu.pipeline_mode<synchronous>, transform_indices = @transform_2, window_bounds = array<i64: 128, 128>}, {pipeline_mode = #tpu.pipeline_mode<synchronous>, transform_indices = @transform_3, window_bounds = array<i64: 128, 128>}, {transform_indices = @transform_4, window_bounds = array<i64: 8, 128>}]} {
    %c0 = arith.constant 0 : index
    %c0_0 = arith.constant 0 : index
    %0 = vector.load %arg1[%c0, %c0_0] : memref<8x128xf32, #tpu.memory_space<vmem>>, vector<8x128xf32>
    %c0_1 = arith.constant 0 : index
    %c0_2 = arith.constant 0 : index
    %1 = vector.load %arg2[%c0_1, %c0_2] : memref<8x128xf32, #tpu.memory_space<vmem>>, vector<1x128xf32>
    %c1 = arith.constant 1 : index
    %c0_3 = arith.constant 0 : index
    %2 = vector.load %arg2[%c1, %c0_3] : memref<8x128xf32, #tpu.memory_space<vmem>>, vector<1x128xf32>
    %c2 = arith.constant 2 : index
    %c0_4 = arith.constant 0 : index
    %3 = vector.load %arg2[%c2, %c0_4] : memref<8x128xf32, #tpu.memory_space<vmem>>, vector<1x128xf32>
    %c3 = arith.constant 3 : index
    %c0_5 = arith.constant 0 : index
    %4 = vector.load %arg2[%c3, %c0_5] : memref<8x128xf32, #tpu.memory_space<vmem>>, vector<1x128xf32>
    %c4 = arith.constant 4 : index
    %c0_6 = arith.constant 0 : index
    %5 = vector.load %arg2[%c4, %c0_6] : memref<8x128xf32, #tpu.memory_space<vmem>>, vector<1x128xf32>
    %c5 = arith.constant 5 : index
    %c0_7 = arith.constant 0 : index
    %6 = vector.load %arg2[%c5, %c0_7] : memref<8x128xf32, #tpu.memory_space<vmem>>, vector<1x128xf32>
    %c6 = arith.constant 6 : index
    %c0_8 = arith.constant 0 : index
    %7 = vector.load %arg2[%c6, %c0_8] : memref<8x128xf32, #tpu.memory_space<vmem>>, vector<1x128xf32>
    %c7 = arith.constant 7 : index
    %c0_9 = arith.constant 0 : index
    %8 = vector.load %arg2[%c7, %c0_9] : memref<8x128xf32, #tpu.memory_space<vmem>>, vector<1x128xf32>
    %cst = arith.constant dense<0.000000e+00> : vector<8xf32>
    %9 = vector.multi_reduction <add>, %0, %cst [1] : vector<8x128xf32> to vector<8xf32>
    %10 = vector.shape_cast %9 : vector<8xf32> to vector<8x1xf32>
    %cst_10 = arith.constant 3.125000e-02 : f32
    %11 = vector.broadcast %cst_10 : f32 to vector<8x1xf32>
    %12 = arith.mulf %10, %11 : vector<8x1xf32>
    %13 = vector.broadcast %12 : vector<8x1xf32> to vector<8x128xf32>
    %14 = arith.subf %0, %13 : vector<8x128xf32>
    %15 = arith.mulf %14, %14 : vector<8x128xf32>
    %cst_11 = arith.constant dense<0.000000e+00> : vector<8xf32>
    %16 = vector.multi_reduction <add>, %15, %cst_11 [1] : vector<8x128xf32> to vector<8xf32>
    %17 = vector.shape_cast %16 : vector<8xf32> to vector<8x1xf32>
    %18 = arith.mulf %12, %12 : vector<8x1xf32>
    %cst_12 = arith.constant 9.600000e+01 : f32
    %19 = vector.broadcast %cst_12 : f32 to vector<8x1xf32>
    %20 = arith.mulf %19, %18 : vector<8x1xf32>
    %21 = arith.subf %17, %20 : vector<8x1xf32>
    %cst_13 = arith.constant 3.125000e-02 : f32
    %22 = vector.broadcast %cst_13 : f32 to vector<8x1xf32>
    %23 = arith.mulf %21, %22 : vector<8x1xf32>
    %cst_14 = arith.constant 0.000000e+00 : f32
    %24 = vector.broadcast %cst_14 : f32 to vector<8x1xf32>
    %25 = arith.maximumf %23, %24 : vector<8x1xf32>
    %cst_15 = arith.constant 9.99999974E-6 : f32
    %26 = vector.broadcast %cst_15 : f32 to vector<8x1xf32>
    %27 = arith.addf %25, %26 : vector<8x1xf32>
    %28 = math.rsqrt %27 : vector<8x1xf32>
    %29 = vector.broadcast %28 : vector<8x1xf32> to vector<8x128xf32>
    %30 = arith.mulf %14, %29 : vector<8x128xf32>
    %31 = vector.broadcast %1 : vector<1x128xf32> to vector<8x128xf32>
    %32 = arith.mulf %30, %31 : vector<8x128xf32>
    %33 = vector.broadcast %2 : vector<1x128xf32> to vector<8x128xf32>
    %34 = arith.addf %32, %33 : vector<8x128xf32>
    %35 = arith.truncf %34 : vector<8x128xf32> to vector<8x128xbf16>
    %c0_16 = arith.constant 0 : index
    %c0_17 = arith.constant 0 : index
    %36 = vector.load %arg3[%c0_16, %c0_17] : memref<128x128xbf16, #tpu.memory_space<vmem>>, vector<128x128xbf16>
    %cst_18 = arith.constant dense<0.000000e+00> : vector<8x128xf32>
    %37 = tpu.matmul %35, %36, %cst_18 {dimension_numbers = #tpu.dot_dimension_numbers<[1], [0], [0], [1], [0, 0, 1, 1], [], []>} : vector<8x128xbf16>, vector<128x128xbf16>, vector<8x128xf32> -> vector<8x128xf32>
    %38 = vector.broadcast %3 : vector<1x128xf32> to vector<8x128xf32>
    %39 = arith.addf %37, %38 : vector<8x128xf32>
    %cst_19 = arith.constant 0.000000e+00 : f32
    %40 = vector.broadcast %cst_19 : f32 to vector<8x128xf32>
    %41 = arith.maximumf %39, %40 : vector<8x128xf32>
    %cst_20 = arith.constant dense<0.000000e+00> : vector<8xf32>
    %42 = vector.multi_reduction <add>, %41, %cst_20 [1] : vector<8x128xf32> to vector<8xf32>
    %43 = vector.shape_cast %42 : vector<8xf32> to vector<8x1xf32>
    %cst_21 = arith.constant 3.125000e-02 : f32
    %44 = vector.broadcast %cst_21 : f32 to vector<8x1xf32>
    %45 = arith.mulf %43, %44 : vector<8x1xf32>
    %46 = vector.broadcast %45 : vector<8x1xf32> to vector<8x128xf32>
    %47 = arith.subf %41, %46 : vector<8x128xf32>
    %48 = arith.mulf %47, %47 : vector<8x128xf32>
    %cst_22 = arith.constant dense<0.000000e+00> : vector<8xf32>
    %49 = vector.multi_reduction <add>, %48, %cst_22 [1] : vector<8x128xf32> to vector<8xf32>
    %50 = vector.shape_cast %49 : vector<8xf32> to vector<8x1xf32>
    %51 = arith.mulf %45, %45 : vector<8x1xf32>
    %cst_23 = arith.constant 9.600000e+01 : f32
    %52 = vector.broadcast %cst_23 : f32 to vector<8x1xf32>
    %53 = arith.mulf %52, %51 : vector<8x1xf32>
    %54 = arith.subf %50, %53 : vector<8x1xf32>
    %cst_24 = arith.constant 3.125000e-02 : f32
    %55 = vector.broadcast %cst_24 : f32 to vector<8x1xf32>
    %56 = arith.mulf %54, %55 : vector<8x1xf32>
    %cst_25 = arith.constant 0.000000e+00 : f32
    %57 = vector.broadcast %cst_25 : f32 to vector<8x1xf32>
    %58 = arith.maximumf %56, %57 : vector<8x1xf32>
    %cst_26 = arith.constant 9.99999974E-6 : f32
    %59 = vector.broadcast %cst_26 : f32 to vector<8x1xf32>
    %60 = arith.addf %58, %59 : vector<8x1xf32>
    %61 = math.rsqrt %60 : vector<8x1xf32>
    %62 = vector.broadcast %61 : vector<8x1xf32> to vector<8x128xf32>
    %63 = arith.mulf %47, %62 : vector<8x128xf32>
    %64 = vector.broadcast %4 : vector<1x128xf32> to vector<8x128xf32>
    %65 = arith.mulf %63, %64 : vector<8x128xf32>
    %66 = vector.broadcast %5 : vector<1x128xf32> to vector<8x128xf32>
    %67 = arith.addf %65, %66 : vector<8x128xf32>
    %68 = arith.truncf %67 : vector<8x128xf32> to vector<8x128xbf16>
    %c0_27 = arith.constant 0 : index
    %c0_28 = arith.constant 0 : index
    %69 = vector.load %arg4[%c0_27, %c0_28] : memref<128x128xbf16, #tpu.memory_space<vmem>>, vector<128x128xbf16>
    %cst_29 = arith.constant dense<0.000000e+00> : vector<8x128xf32>
    %70 = tpu.matmul %68, %69, %cst_29 {dimension_numbers = #tpu.dot_dimension_numbers<[1], [0], [0], [1], [0, 0, 1, 1], [], []>} : vector<8x128xbf16>, vector<128x128xbf16>, vector<8x128xf32> -> vector<8x128xf32>
    %71 = vector.broadcast %6 : vector<1x128xf32> to vector<8x128xf32>
    %72 = arith.addf %70, %71 : vector<8x128xf32>
    %cst_30 = arith.constant 0.000000e+00 : f32
    %73 = vector.broadcast %cst_30 : f32 to vector<8x128xf32>
    %74 = arith.maximumf %72, %73 : vector<8x128xf32>
    %cst_31 = arith.constant dense<0.000000e+00> : vector<8xf32>
    %75 = vector.multi_reduction <add>, %74, %cst_31 [1] : vector<8x128xf32> to vector<8xf32>
    %76 = vector.shape_cast %75 : vector<8xf32> to vector<8x1xf32>
    %cst_32 = arith.constant 3.125000e-02 : f32
    %77 = vector.broadcast %cst_32 : f32 to vector<8x1xf32>
    %78 = arith.mulf %76, %77 : vector<8x1xf32>
    %79 = vector.broadcast %78 : vector<8x1xf32> to vector<8x128xf32>
    %80 = arith.subf %74, %79 : vector<8x128xf32>
    %81 = arith.mulf %80, %80 : vector<8x128xf32>
    %cst_33 = arith.constant dense<0.000000e+00> : vector<8xf32>
    %82 = vector.multi_reduction <add>, %81, %cst_33 [1] : vector<8x128xf32> to vector<8xf32>
    %83 = vector.shape_cast %82 : vector<8xf32> to vector<8x1xf32>
    %84 = arith.mulf %78, %78 : vector<8x1xf32>
    %cst_34 = arith.constant 9.600000e+01 : f32
    %85 = vector.broadcast %cst_34 : f32 to vector<8x1xf32>
    %86 = arith.mulf %85, %84 : vector<8x1xf32>
    %87 = arith.subf %83, %86 : vector<8x1xf32>
    %cst_35 = arith.constant 3.125000e-02 : f32
    %88 = vector.broadcast %cst_35 : f32 to vector<8x1xf32>
    %89 = arith.mulf %87, %88 : vector<8x1xf32>
    %cst_36 = arith.constant 0.000000e+00 : f32
    %90 = vector.broadcast %cst_36 : f32 to vector<8x1xf32>
    %91 = arith.maximumf %89, %90 : vector<8x1xf32>
    %cst_37 = arith.constant 9.99999974E-6 : f32
    %92 = vector.broadcast %cst_37 : f32 to vector<8x1xf32>
    %93 = arith.addf %91, %92 : vector<8x1xf32>
    %94 = math.rsqrt %93 : vector<8x1xf32>
    %95 = vector.broadcast %94 : vector<8x1xf32> to vector<8x128xf32>
    %96 = arith.mulf %80, %95 : vector<8x128xf32>
    %97 = vector.broadcast %7 : vector<1x128xf32> to vector<8x128xf32>
    %98 = arith.mulf %96, %97 : vector<8x128xf32>
    %99 = vector.broadcast %8 : vector<1x128xf32> to vector<8x128xf32>
    %100 = arith.addf %98, %99 : vector<8x128xf32>
    %c0_38 = arith.constant 0 : index
    %c0_39 = arith.constant 0 : index
    %101 = vector.load %arg5[%c0_38, %c0_39] : memref<8x128xf32, #tpu.memory_space<vmem>>, vector<8x128xf32>
    tpu.vector_store %arg5[%c0_38, %c0_39], %100 {strides = array<i32>} : memref<8x128xf32, #tpu.memory_space<vmem>>, vector<8x128xf32>,
    return
  }
  func.func @transform_0(%arg0: i32) -> (i32, i32) {
    %c0_i32 = arith.constant 0 : i32
    %c0_i32_0 = arith.constant 0 : i32
    return %arg0, %c0_i32 : i32, i32
  }
  func.func @transform_1(%arg0: i32) -> (i32, i32) {
    %c0_i32 = arith.constant 0 : i32
    %c0_i32_0 = arith.constant 0 : i32
    %c0_i32_1 = arith.constant 0 : i32
    return %c0_i32, %c0_i32_0 : i32, i32
  }
  func.func @transform_2(%arg0: i32) -> (i32, i32) {
    %c0_i32 = arith.constant 0 : i32
    %c0_i32_0 = arith.constant 0 : i32
    %c0_i32_1 = arith.constant 0 : i32
    return %c0_i32, %c0_i32_0 : i32, i32
  }
  func.func @transform_3(%arg0: i32) -> (i32, i32) {
    %c0_i32 = arith.constant 0 : i32
    %c0_i32_0 = arith.constant 0 : i32
    %c0_i32_1 = arith.constant 0 : i32
    return %c0_i32, %c0_i32_0 : i32, i32
  }
  func.func @transform_4(%arg0: i32) -> (i32, i32) {
    %c0_i32 = arith.constant 0 : i32
    %c0_i32_0 = arith.constant 0 : i32
    return %arg0, %c0_i32 : i32, i32
  }
}

</mosaic_0001>

<bundles_post_ra>
// kernel: tpu_custom_call.1
= control target key start
LH: loop header
LB: loop body
LE: loop exit
PB: predicated region body
PF: predicated region fallthrough
CT: control target
= control target key end

     0   :  { %9 = vsyncpa [#allocation3], 0  ;;  %s680_s0 = inlined_call_operand.hbm [shape: f32[8,128], index: 0, kind: input, shape index: {}]   ;;  %s681_s1 = inlined_call_operand.hbm [shape: f32[8,128], index: 1, kind: input, shape index: {}]   ;;  %s682_s2 = inlined_call_operand.hbm [shape: bf16[128,128], index: 2, kind: input, shape index: {}]   ;;  %s683_s3 = inlined_call_operand.hbm [shape: bf16[128,128], index: 3, kind: input, shape index: {}]   ;;  %s684_s4 = inlined_call_operand.hbm [shape: f32[8,128], index: 4, kind: output, shape index: {}]  }
   0x1   :  { %10 = vsyncpa [#allocation6], 0 }
   0x2   :  { %11 = vsyncpa [#allocation9], 0 }
   0x3   :  { %12 = vsyncpa [#allocation4], 0  ;;  %s613_s15 = smov [#allocation5]   ;;  %s614_s17 = smov [#allocation2]  }
   0x4   :  { %s29_s16 = sshll.u32 %s613_s15, 4  ;;  %s19_s18 = sshll.u32 %s614_s17, 4  ;;  %s30_s16 = int_to_ptr.vmem [resolvable:$true] %s29_s16  ;;  %s20_s18 = int_to_ptr.vmem [resolvable:$true] %s19_s18 }
   0x5   :  { %s513_s19 = scalar_lea.vmem %s30_s16, 128  ;;  %p518_p1 = scmp.lt.s32.totalorder %s30_s16, %s30_s16 }
   0x6   :  { %p514_p0 = scmp.ne.s32.totalorder %s30_s16, %s513_s19  ;;  %p519_p2 = scmp.lt.s32.totalorder %s513_s19, %s513_s19 }
   0x8   :  { %p520_p3 = por %p519_p2, %p518_p1 }
   0xa   :  { %p521_p4 = pnand %p520_p3, %p514_p0 }
   0xc   :  { %524 = shalt.err (!%p521_p4)
}
   0xd   :  { %32 = dma.hbm_to_vmem [thread:$0]  %s681_s1, 128, %s30_s16, [#allocation6]  }
   0xe   :  { %s533_s22 = scalar_lea.vmem %s20_s18, 128  ;;  %p538_p6 = scmp.lt.s32.totalorder %s20_s18, %s20_s18 }
   0xf   :  { %p534_p5 = scmp.ne.s32.totalorder %s20_s18, %s533_s22  ;;  %p539_p7 = scmp.lt.s32.totalorder %s533_s22, %s533_s22 }
  0x11   :  { %p540_p8 = por %p539_p7, %p538_p6 }
  0x13   :  { %p541_p9 = pnand %p540_p8, %p534_p5 }
  0x15   :  { %544 = shalt.err (!%p541_p9)
}
  0x16   :  { %22 = dma.hbm_to_vmem [thread:$0]  %s680_s0, 128, %s20_s18, [#allocation3]  }
  0x17   :  { %s615_s25 = smov [#allocation7]  }
  0x18   :  { %s38_s26 = sshll.u32 %s615_s25, 4  ;;  %s39_s26 = int_to_ptr.vmem [resolvable:$true] %s38_s26 }
  0x19   :  { %s553_s27 = scalar_lea.vmem %s39_s26, 1024  ;;  %p558_p11 = scmp.lt.s32.totalorder %s39_s26, %s39_s26 }
  0x1a   :  { %p554_p10 = scmp.ne.s32.totalorder %s39_s26, %s553_s27  ;;  %p559_p12 = scmp.lt.s32.totalorder %s553_s27, %s553_s27 }
  0x1c   :  { %p560_p13 = por %p559_p12, %p558_p11 }
  0x1e   :  { %p561_p0 = pnand %p560_p13, %p554_p10 }
  0x20   :  { %564 = shalt.err (!%p561_p0)
}
  0x21   :  { %s616_s1 = smov 64   ;;  %s617_s28 = smov 4  }
  0x22   :  { %44 = dma.hbm_to_vmem [thread:$0]  %s682_s2, 1024, %s39_s26, [#allocation6], %s616_s1, %s616_s1, %s617_s28  }
  0x23   :  { %s618_s5 = smov [#allocation8]  }
  0x24   :  { %s50_s6 = sshll.u32 %s618_s5, 4  ;;  %s51_s6 = int_to_ptr.vmem [resolvable:$true] %s50_s6 }
  0x25   :  { %s573_s0 = scalar_lea.vmem %s51_s6, 1024  ;;  %p578_p2 = scmp.lt.s32.totalorder %s51_s6, %s51_s6 }
  0x26   :  { %p574_p1 = scmp.ne.s32.totalorder %s51_s6, %s573_s0  ;;  %p579_p3 = scmp.lt.s32.totalorder %s573_s0, %s573_s0 }
  0x28   :  { %p580_p4 = por %p579_p3, %p578_p2 }
  0x2a   :  { %p581_p5 = pnand %p580_p4, %p574_p1 }
  0x2c   :  { %584 = shalt.err (!%p581_p5)
}
  0x2d   :  { %56 = dma.hbm_to_vmem [thread:$0]  %s683_s3, 1024, %s51_s6, [#allocation9], %s616_s1, %s616_s1, %s617_s28  }
  0x2e   :  { %605 = dma.done.wait [#allocation3], 128  }
  0x2f   :  { %606 = vsyncadd [#allocation3], 4294967168 }
  0x30   :  { %607 = dma.done.wait [#allocation6], 1152  }
  0x31   :  { %608 = vsyncadd [#allocation6], 4294966144 }
  0x32   :  { %609 = dma.done.wait [#allocation9], 1024  }
  0x33   :  { %610 = vsyncadd [#allocation9], 4294966272  ;;  %v70_v0 = vld [vmem:[#allocation2] sm:$0xff]  ;;  %v483_v1 = vld [vmem:[#allocation7 + $0x38] sm:$0xff]   ;;  %v619_v2 = vmov 0.0   ;;  %vm620_vm0 = vmmov 0  }
  0x34   :  { %79 = vadd.xlane.f32.xlu0 %v70_v0  ;;  %434 = vmatprep.subr.bf16.mxu0 %v619_v2  ;;  %v484_v7 = vld [vmem:[#allocation7 + $0x30] sm:$0xff]   ;;  %v485_v8 = vld [vmem:[#allocation7 + $0x28] sm:$0xff]   ;;  %v486_v9 = vld [vmem:[#allocation7 + $0x20] sm:$0xff]   ;;  %s621_s2 = smov [#allocation10]  }
  0x35   :  { %454 = vmatprep.subr.bf16.mxu1 %v619_v2  ;;  %435 = vmatpush3.bf16.msra.mxu0 %v483_v1  ;;  %v487_v10 = vld [vmem:[#allocation7 + $0x18] sm:$0xff]   ;;  %v488_v11 = vld [vmem:[#allocation7 + $0x10] sm:$0xff]   ;;  %v489_v12 = vld [vmem:[#allocation7 + $0x8] sm:$0xff]   ;;  %s381_s3 = sshll.u32 %s621_s2, 4  ;;  %s382_s3 = int_to_ptr.vmem [resolvable:$true] %s381_s3 }
  0x36   :  { %436 = vmatprep.subr.bf16.mxu0 %v619_v2  ;;  %450 = vmatprep.mubr.msk.bf16.mxu0 %vm620_vm0, %v619_v2  ;;  %v490_v13 = vld [vmem:[#allocation7] sm:$0xff]   ;;  %v392_v22 = vld [vmem:[#allocation5] ss:$0 sm:$0xff]  ;;  %v393_v24 = vld [vmem:[#allocation5 + $0x1] ss:$0 sm:$0xff]  ;;  %s585_s9 = scalar_lea.vmem %s382_s3, 128  ;;  %p590_p7 = scmp.lt.s32.totalorder %s382_s3, %s382_s3 }
  0x37   :  { %470 = vmatprep.mubr.msk.bf16.mxu1 %vm620_vm0, %v619_v2  ;;  %v394_v28 = vld [vmem:[#allocation5 + $0x2] ss:$0 sm:$0xff]  ;;  %v492_v40 = vld [vmem:[#allocation8 + $0x30] sm:$0xff]   ;;  %v493_v41 = vld [vmem:[#allocation8 + $0x28] sm:$0xff]   ;;  %p586_p6 = scmp.ne.s32.totalorder %s382_s3, %s585_s9  ;;  %p591_p8 = scmp.lt.s32.totalorder %s585_s9, %s585_s9 }
  0x38   :  { %v491_v35 = vld [vmem:[#allocation8 + $0x38] sm:$0xff]   ;;  %v494_v42 = vld [vmem:[#allocation8 + $0x20] sm:$0xff]   ;;  %v496_v44 = vld [vmem:[#allocation8 + $0x10] sm:$0xff]  }
  0x39   :  { %437 = vmatpush3.bf16.msra.mxu0 %v484_v7  ;;  %455 = vmatpush3.bf16.msra.mxu1 %v491_v35  ;;  %v495_v43 = vld [vmem:[#allocation8 + $0x18] sm:$0xff]   ;;  %v497_v45 = vld [vmem:[#allocation8 + $0x8] sm:$0xff]   ;;  %v498_v46 = vld [vmem:[#allocation8] sm:$0xff]   ;;  %p592_p9 = por %p591_p8, %p590_p7 }
  0x3a   :  { %438 = vmatprep.subr.bf16.mxu0 %v619_v2  ;;  %456 = vmatprep.subr.bf16.mxu1 %v619_v2  ;;  %v403_v55 = vld [vmem:[#allocation5 + $0x3] ss:$0 sm:$0xff]  ;;  %v404_v57 = vld [vmem:[#allocation5 + $0x4] ss:$0 sm:$0xff]  ;;  %v405_v61 = vld [vmem:[#allocation5 + $0x5] ss:$0 sm:$0xff] }
  0x3b   :  { %p593_p10 = pnand %p592_p9, %p586_p6 }
  0x3d   :  { %439 = vmatpush3.bf16.msra.mxu0 %v485_v8  ;;  %457 = vmatpush3.bf16.msra.mxu1 %v492_v40 }
  0x3e   :  { %440 = vmatprep.subr.bf16.mxu0 %v619_v2  ;;  %458 = vmatprep.subr.bf16.mxu1 %v619_v2 }
  0x41   :  { %441 = vmatpush3.bf16.msra.mxu0 %v486_v9  ;;  %459 = vmatpush3.bf16.msra.mxu1 %v493_v41 }
  0x42   :  { %442 = vmatprep.subr.bf16.mxu0 %v619_v2  ;;  %460 = vmatprep.subr.bf16.mxu1 %v619_v2 }
  0x45   :  { %443 = vmatpush3.bf16.msra.mxu0 %v487_v10  ;;  %461 = vmatpush3.bf16.msra.mxu1 %v494_v42 }
  0x46   :  { %444 = vmatprep.subr.bf16.mxu0 %v619_v2  ;;  %462 = vmatprep.subr.bf16.mxu1 %v619_v2 }
  0x49   :  { %445 = vmatpush3.bf16.msra.mxu0 %v488_v11  ;;  %463 = vmatpush3.bf16.msra.mxu1 %v495_v43 }
  0x4a   :  { %446 = vmatprep.subr.bf16.mxu0 %v619_v2  ;;  %464 = vmatprep.subr.bf16.mxu1 %v619_v2 }
  0x4d   :  { %447 = vmatpush3.bf16.msra.mxu0 %v489_v12  ;;  %465 = vmatpush3.bf16.msra.mxu1 %v496_v44 }
  0x4e   :  { %448 = vmatprep.subr.bf16.mxu0 %v619_v2  ;;  %466 = vmatprep.subr.bf16.mxu1 %v619_v2 }
  0x51   :  { %449 = vmatpush3.bf16.msra.mxu0 %v490_v13  ;;  %467 = vmatpush3.bf16.msra.mxu1 %v497_v45 }
  0x52   :  { %468 = vmatprep.subr.bf16.mxu1 %v619_v2 }
  0x55   :  { %469 = vmatpush3.bf16.msra.mxu1 %v498_v46 }
  0xbd   :  { %v80_v3 = vpop.xlane.xlu0 %79 }
  0xbe   :  { %v81_v4 = vmul.f32 0.03125, %v80_v3 }
  0xc0   :  { %v82_v5 = vsub.f32 %v70_v0, %v81_v4  ;;  %v86_v14 = vmul.f32 %v81_v4, %v81_v4 }
  0xc2   :  { %v83_v6 = vmul.f32 %v82_v5, %v82_v5  ;;  %v87_v15 = vmul.f32 96.0, %v86_v14 }
  0xc4   :  { %84 = vadd.xlane.f32.xlu0 %v83_v6 }
 0x14d   :  { %v85_v16 = vpop.xlane.xlu0 %84 }
 0x14e   :  { %v88_v17 = vsub.f32 %v85_v16, %v87_v15  ;;  %v414_v16 = vld [vmem:[#allocation5 + $0x6] ss:$0 sm:$0xff] }
 0x150   :  { %v89_v18 = vmul.f32 0.03125, %v88_v17 }
 0x152   :  { %v90_v19 = vmax.f32 %v89_v18, 0.0  ;;  %v415_v18 = vld [vmem:[#allocation5 + $0x7] ss:$0 sm:$0xff] }
 0x154   :  { %v91_v20 = vadd.f32 1e-05, %v90_v19 }
 0x156   :  { %499 = vrsqrt.f32 %v91_v20 }
 0x163   :  { %v500_v21 = vpop.eup %499 }
 0x164   :  { %v93_v23 = vmul.f32 %v500_v21, %v82_v5 }
 0x166   :  { %v98_v25 = vmul.f32 %v392_v22, %v93_v23 }
 0x168   :  { %v103_v26 = vadd.f32 %v393_v24, %v98_v25 }
 0x16a   :  { %v104_v27 = vpack.c.bf16 %v103_v26, %v103_v26 }
 0x16c   :  { %451 = vmatmul.mubr.bf16.vlgmr.msra.gmra.mxu0 %v104_v27 }
 0x22c   :  { %v207_v29 = vpop.f32.mrf.mxu0 }
 0x22d   :  { %v208_v30 = vadd.f32 %v394_v28, %v207_v29 }
 0x22e   :  { %v452_v31 = vpop.f32.mrf.mxu0 }
 0x22f   :  { %v213_v32 = vmax.f32 %v208_v30, 0.0 }
 0x230   :  { %v210_v33 = vpop.f32.mrf.mxu0 }
 0x231   :  { %214 = vadd.xlane.f32.xlu1 %v213_v32 }
 0x232   :  { %v453_v34 = vpop.f32.mrf.mxu0 }
 0x2ba   :  { %v215_v36 = vpop.xlane.xlu1 %214 }
 0x2bb   :  { %v216_v37 = vmul.f32 0.03125, %v215_v36 }
 0x2bd   :  { %v217_v38 = vsub.f32 %v213_v32, %v216_v37  ;;  %v221_v47 = vmul.f32 %v216_v37, %v216_v37 }
 0x2bf   :  { %v218_v39 = vmul.f32 %v217_v38, %v217_v38  ;;  %v222_v48 = vmul.f32 96.0, %v221_v47 }
 0x2c1   :  { %219 = vadd.xlane.f32.xlu1 %v218_v39 }
 0x34a   :  { %v220_v49 = vpop.xlane.xlu1 %219 }
 0x34b   :  { %v223_v50 = vsub.f32 %v220_v49, %v222_v48 }
 0x34d   :  { %v224_v51 = vmul.f32 0.03125, %v223_v50 }
 0x34f   :  { %v225_v52 = vmax.f32 %v224_v51, 0.0 }
 0x351   :  { %v226_v53 = vadd.f32 1e-05, %v225_v52 }
 0x353   :  { %501 = vrsqrt.f32 %v226_v53 }
 0x360   :  { %v502_v54 = vpop.eup %501 }
 0x361   :  { %v228_v56 = vmul.f32 %v502_v54, %v217_v38 }
 0x363   :  { %v233_v58 = vmul.f32 %v403_v55, %v228_v56 }
 0x365   :  { %v238_v59 = vadd.f32 %v404_v57, %v233_v58 }
 0x367   :  { %v239_v60 = vpack.c.bf16 %v238_v59, %v238_v59 }
 0x369   :  { %471 = vmatmul.mubr.bf16.vlgmr.msra.gmra.mxu1 %v239_v60 }
 0x429   :  { %v342_v62 = vpop.f32.mrf.mxu1 }
 0x42a   :  { %v343_v63 = vadd.f32 %v405_v61, %v342_v62 }
 0x42b   :  { %v472_v0 = vpop.f32.mrf.mxu1 }
 0x42c   :  { %v348_v1 = vmax.f32 %v343_v63, 0.0 }
 0x42d   :  { %v345_v2 = vpop.f32.mrf.mxu1 }
 0x42e   :  { %349 = vadd.xlane.f32.xlu0 %v348_v1 }
 0x42f   :  { %v473_v3 = vpop.f32.mrf.mxu1 }
 0x4b7   :  { %v350_v4 = vpop.xlane.xlu0 %349 }
 0x4b8   :  { %v351_v5 = vmul.f32 0.03125, %v350_v4 }
 0x4ba   :  { %v352_v6 = vsub.f32 %v348_v1, %v351_v5  ;;  %v356_v8 = vmul.f32 %v351_v5, %v351_v5 }
 0x4bc   :  { %v353_v7 = vmul.f32 %v352_v6, %v352_v6  ;;  %v357_v9 = vmul.f32 96.0, %v356_v8 }
 0x4be   :  { %354 = vadd.xlane.f32.xlu1 %v353_v7 }
 0x547   :  { %v355_v10 = vpop.xlane.xlu1 %354 }
 0x548   :  { %v358_v11 = vsub.f32 %v355_v10, %v357_v9 }
 0x54a   :  { %v359_v12 = vmul.f32 0.03125, %v358_v11 }
 0x54c   :  { %v360_v13 = vmax.f32 %v359_v12, 0.0 }
 0x54e   :  { %v361_v14 = vadd.f32 1e-05, %v360_v13 }
 0x550   :  { %503 = vrsqrt.f32 %v361_v14 }
 0x55d   :  { %v504_v15 = vpop.eup %503 }
 0x55e   :  { %v363_v17 = vmul.f32 %v504_v15, %v352_v6 }
 0x560   :  { %v368_v19 = vmul.f32 %v414_v16, %v363_v17 }
 0x562   :  { %v373_v20 = vadd.f32 %v415_v18, %v368_v19 }
 0x564   :  { %374 = vst [vmem:[#allocation10] sm:$0xff] %v373_v20 }
 0x565   :  { %596 = shalt.err (!%p593_p10)
}
 0x566   :  { %384 = dma.vmem_to_hbm [thread:$0]  %s382_s3, 128, %s684_s4, [#allocation4]  }
 0x567   :  { %611 = dma.done.wait [#allocation4], 128  }
 0x568   :  { %612 = vsyncadd [#allocation4], 4294967168 }
 0x569   :  { %388 = vsyncpa [#allocation3], 1 }
 0x56a   :  { %389 = vsyncpa [#allocation6], 1 }
 0x56b   :  { %390 = vsyncpa [#allocation9], 1 }
 0x56c   :  { %391 = vsyncpa [#allocation4], 1 }

</bundles_post_ra>
